<compile_context>
chip_gen: v5e
topology: v5e:2x2
jax: 0.10.0
libtpu: 0.0.40
codegen_flags: <defaults>
</compile_context>

<pallas_src>
import functools

import jax
import jax.numpy as jnp
from jax.experimental import pallas as pl
from jax.experimental.pallas import tpu as pltpu

_LANE = 128
_SUBLANE = 8


def _round_up(x, m):
    return ((x + m - 1) // m) * m


def _pad_to(a, shape):
    pads = [(0, t - s) for s, t in zip(a.shape, shape)]
    return jnp.pad(a, pads)


def fcn_kernel(x_ref, w1_ref, b1_ref, w2_ref, b2_ref, w3_ref, b3_ref, o_ref, *, out_dim):
    # x arrives as f32 and is cast to bf16 in-kernel (no extra HBM pass in the wrapper).
    x = x_ref[...].astype(jnp.bfloat16)

    h1 = jnp.dot(x, w1_ref[...], preferred_element_type=jnp.float32) + b1_ref[...]
    h1 = jnp.maximum(h1, 0.0)

    h2 = jnp.dot(h1.astype(jnp.bfloat16), w2_ref[...],
                 preferred_element_type=jnp.float32) + b2_ref[...]
    h2 = jnp.maximum(h2, 0.0)

    h3 = jnp.dot(h2.astype(jnp.bfloat16), w3_ref[...],
                 preferred_element_type=jnp.float32) + b3_ref[...]

    # Only the first `out_dim` (=2) columns are real; store them into the narrow output.
    o_ref[...] = h3[:, :out_dim].astype(o_ref.dtype)


def _tpu_vmem_bytes():
    try:
        return int(pltpu.get_tpu_info().vmem_capacity_bytes)
    except Exception:
        return 64 << 20  # conservative default (v7x-sized VMEM)


def fcn_net_forward(x, params, *, batch_tile=None):
    """x: (B, n_class) float32.  params: w1,b1,w2,b2,w3,b3 with weights in (in, out) layout."""
    B, n_class = x.shape
    w1, b1 = params["w1"], params["b1"]   # (n_class, 100), (1, 100)
    w2, b2 = params["w2"], params["b2"]   # (100, 50),      (1, 50)
    w3, b3 = params["w3"], params["b3"]   # (50, 2),        (1, 2)
    h1_dim, h2_dim, out_dim = w1.shape[1], w2.shape[1], w3.shape[1]

    # Lane-aligned zero padding of hidden/output dims (exact through bias+ReLU).
    h1_p = _round_up(h1_dim, _LANE)
    h2_p = _round_up(h2_dim, _LANE)
    out_p = _round_up(out_dim, _LANE)

    # Host-side weight prep (tiny arrays): pad to lane-dense shapes, weights -> bf16.
    w1p = _pad_to(w1, (n_class, h1_p)).astype(jnp.bfloat16)
    b1p = _pad_to(b1, (1, h1_p)).astype(jnp.float32)
    w2p = _pad_to(w2, (h1_p, h2_p)).astype(jnp.bfloat16)
    b2p = _pad_to(b2, (1, h2_p)).astype(jnp.float32)
    w3p = _pad_to(w3, (h2_p, out_p)).astype(jnp.bfloat16)
    b3p = _pad_to(b3, (1, out_p)).astype(jnp.float32)

    # --- generation-aware batch tiling -------------------------------------------------
    vmem_bytes = _tpu_vmem_bytes()
    small_vmem = vmem_bytes < (100 << 20)           # v7x-like: 64 MiB VMEM, 2 TensorCores
    cap = 4096 if small_vmem else 8192

    if batch_tile is None:
        bt = cap
    else:
        bt = batch_tile
    bt = min(bt, _round_up(B, _SUBLANE))
    bt = max(_SUBLANE, _round_up(bt, _SUBLANE))

    if batch_tile is None and small_vmem:
        # 2 TensorCores: aim for >= 2 grid steps per core when B allows, but never
        # shrink the tile below 256 rows just to manufacture steps.
        while pl.cdiv(B, bt) < 4 and bt > 256:
            bt = max(256, _round_up(bt // 2, _SUBLANE))

    grid = (pl.cdiv(B, bt),)
    vmem_limit = int(min(64 << 20, (vmem_bytes * 3) // 4))

    kernel = functools.partial(fcn_kernel, out_dim=out_dim)

    def _resident_spec(shape, wmode):
        idx = lambda i: tuple(0 for _ in shape)
        if wmode is None:
            return pl.BlockSpec(shape, idx)
        return pl.BlockSpec(shape, idx, pipeline_mode=wmode)

    def _run(single_buffer_weights):
        wmode = pl.Buffered(1) if single_buffer_weights else None
        call = pl.pallas_call(
            kernel,
            out_shape=jax.ShapeDtypeStruct((B, out_dim), x.dtype),
            grid_spec=pltpu.PrefetchScalarGridSpec(
                num_scalar_prefetch=0,
                grid=grid,
                in_specs=[
                    pl.BlockSpec((bt, n_class), lambda i: (i, 0)),   # streamed x tile (f32)
                    _resident_spec(w1p.shape, wmode),                 # resident weights/biases
                    _resident_spec(b1p.shape, wmode),
                    _resident_spec(w2p.shape, wmode),
                    _resident_spec(b2p.shape, wmode),
                    _resident_spec(w3p.shape, wmode),
                    _resident_spec(b3p.shape, wmode),
                ],
                out_specs=pl.BlockSpec((bt, out_dim), lambda i: (i, 0)),   # narrow (bt, 2) out
            ),
            compiler_params=pltpu.CompilerParams(
                dimension_semantics=("parallel",),
                vmem_limit_bytes=vmem_limit,
            ),
        )
        return call(x, w1p, b1p, w2p, b2p, w3p, b3p)

    try:
        return _run(True)
    except Exception:
        # pipeline_mode=pl.Buffered(1) not accepted by this JAX build: use default specs.
        return _run(False)


def init_params(key, n_class):
    """Deterministic init matching FCN_net layer shapes (weights stored as (in, out))."""
    ks = jax.random.split(key, 6)

    def linear(kw, kb, fan_in, fan_out):
        bound = 1.0 / jnp.sqrt(fan_in)
        w = jax.random.uniform(kw, (fan_in, fan_out), jnp.float32, -bound, bound)
        b = jax.random.uniform(kb, (1, fan_out), jnp.float32, -bound, bound)
        return w, b

    w1, b1 = linear(ks[0], ks[1], n_class, 100)
    w2, b2 = linear(ks[2], ks[3], 100, 50)
    w3, b3 = linear(ks[4], ks[5], 50, 2)
    return dict(w1=w1, b1=b1, w2=w2, b2=b2, w3=w3, b3=b3)


def fcn_net_reference(x, p):
    h1 = jnp.maximum(x @ p["w1"] + p["b1"], 0.0)
    h2 = jnp.maximum(h1 @ p["w2"] + p["b2"], 0.0)
    return h2 @ p["w3"] + p["b3"]


if __name__ == "__main__":
    key = jax.random.PRNGKey(0)
    k_in, k_in2, k_par = jax.random.split(key, 3)

    n_class = 16   # number of input features (n_class)
    params = init_params(k_par, n_class)

    # Case 1: sublane-aligned batch.
    batch = 16
    x = jax.random.normal(k_in, (batch, n_class), jnp.float32)
    out = jax.block_until_ready(fcn_net_forward(x, params))
    ref = fcn_net_reference(x, params)
    assert out.shape == (batch, 2)
    # bf16 inputs/weights with f32 accumulation -> small relative error vs f32 reference.
    assert jnp.allclose(out, ref, atol=2e-2, rtol=2e-2), "mismatch vs reference (aligned)"

    # Case 2: ragged batch (exercises the masked last block on load and store).
    batch2 = 13
    x2 = jax.random.normal(k_in2, (batch2, n_class), jnp.float32)
    out2 = jax.block_until_ready(fcn_net_forward(x2, params))
    ref2 = fcn_net_reference(x2, params)
    assert out2.shape == (batch2, 2)
    assert jnp.allclose(out2, ref2, atol=2e-2, rtol=2e-2), "mismatch vs reference (ragged)"

    print("KERNEL_OK")
</pallas_src>

<mosaic_0001>
module attributes {stable_mosaic.version = 11 : i64} {
  func.func @fcn_kernel(%arg0: i32, %arg1: memref<16x16xf32, #tpu.memory_space<vmem>>, %arg2: memref<16x128xbf16, #tpu.memory_space<vmem>>, %arg3: memref<1x128xf32, #tpu.memory_space<vmem>>, %arg4: memref<128x128xbf16, #tpu.memory_space<vmem>>, %arg5: memref<1x128xf32, #tpu.memory_space<vmem>>, %arg6: memref<128x128xbf16, #tpu.memory_space<vmem>>, %arg7: memref<1x128xf32, #tpu.memory_space<vmem>>, %arg8: memref<16x2xf32, #tpu.memory_space<vmem>>) attributes {dimension_semantics = [#tpu.dimension_semantics<parallel>], iteration_bounds = array<i64: 1>, scalar_prefetch = 0 : i64, scratch_operands = 0 : i64, tpu.core_type = #tpu.core_type<tc>, window_params = [{transform_indices = @transform_0, window_bounds = array<i64: 16, 16>}, {pipeline_mode = #tpu.pipeline_mode<synchronous>, transform_indices = @transform_1, window_bounds = array<i64: 16, 128>}, {pipeline_mode = #tpu.pipeline_mode<synchronous>, transform_indices = @transform_2, window_bounds = array<i64: 1, 128>}, {pipeline_mode = #tpu.pipeline_mode<synchronous>, transform_indices = @transform_3, window_bounds = array<i64: 128, 128>}, {pipeline_mode = #tpu.pipeline_mode<synchronous>, transform_indices = @transform_4, window_bounds = array<i64: 1, 128>}, {pipeline_mode = #tpu.pipeline_mode<synchronous>, transform_indices = @transform_5, window_bounds = array<i64: 128, 128>}, {pipeline_mode = #tpu.pipeline_mode<synchronous>, transform_indices = @transform_6, window_bounds = array<i64: 1, 128>}, {transform_indices = @transform_7, window_bounds = array<i64: 16, 2>}]} {
    %c0 = arith.constant 0 : index
    %c0_0 = arith.constant 0 : index
    %0 = vector.load %arg1[%c0, %c0_0] : memref<16x16xf32, #tpu.memory_space<vmem>>, vector<16x16xf32>
    %1 = arith.truncf %0 : vector<16x16xf32> to vector<16x16xbf16>
    %c0_1 = arith.constant 0 : index
    %c0_2 = arith.constant 0 : index
    %2 = vector.load %arg2[%c0_1, %c0_2] : memref<16x128xbf16, #tpu.memory_space<vmem>>, vector<16x128xbf16>
    %cst = arith.constant dense<0.000000e+00> : vector<16x128xf32>
    %3 = tpu.matmul %1, %2, %cst {dimension_numbers = #tpu.dot_dimension_numbers<[1], [0], [0], [1], [0, 0, 1, 1], [], []>} : vector<16x16xbf16>, vector<16x128xbf16>, vector<16x128xf32> -> vector<16x128xf32>
    %c0_3 = arith.constant 0 : index
    %c0_4 = arith.constant 0 : index
    %4 = vector.load %arg3[%c0_3, %c0_4] : memref<1x128xf32, #tpu.memory_space<vmem>>, vector<1x128xf32>
    %5 = vector.broadcast %4 : vector<1x128xf32> to vector<16x128xf32>
    %6 = arith.addf %3, %5 : vector<16x128xf32>
    %cst_5 = arith.constant 0.000000e+00 : f32
    %7 = vector.broadcast %cst_5 : f32 to vector<16x128xf32>
    %8 = arith.maximumf %6, %7 : vector<16x128xf32>
    %9 = arith.truncf %8 : vector<16x128xf32> to vector<16x128xbf16>
    %c0_6 = arith.constant 0 : index
    %c0_7 = arith.constant 0 : index
    %10 = vector.load %arg4[%c0_6, %c0_7] : memref<128x128xbf16, #tpu.memory_space<vmem>>, vector<128x128xbf16>
    %cst_8 = arith.constant dense<0.000000e+00> : vector<16x128xf32>
    %11 = tpu.matmul %9, %10, %cst_8 {dimension_numbers = #tpu.dot_dimension_numbers<[1], [0], [0], [1], [0, 0, 1, 1], [], []>} : vector<16x128xbf16>, vector<128x128xbf16>, vector<16x128xf32> -> vector<16x128xf32>
    %c0_9 = arith.constant 0 : index
    %c0_10 = arith.constant 0 : index
    %12 = vector.load %arg5[%c0_9, %c0_10] : memref<1x128xf32, #tpu.memory_space<vmem>>, vector<1x128xf32>
    %13 = vector.broadcast %12 : vector<1x128xf32> to vector<16x128xf32>
    %14 = arith.addf %11, %13 : vector<16x128xf32>
    %cst_11 = arith.constant 0.000000e+00 : f32
    %15 = vector.broadcast %cst_11 : f32 to vector<16x128xf32>
    %16 = arith.maximumf %14, %15 : vector<16x128xf32>
    %17 = arith.truncf %16 : vector<16x128xf32> to vector<16x128xbf16>
    %c0_12 = arith.constant 0 : index
    %c0_13 = arith.constant 0 : index
    %18 = vector.load %arg6[%c0_12, %c0_13] : memref<128x128xbf16, #tpu.memory_space<vmem>>, vector<128x128xbf16>
    %cst_14 = arith.constant dense<0.000000e+00> : vector<16x128xf32>
    %19 = tpu.matmul %17, %18, %cst_14 {dimension_numbers = #tpu.dot_dimension_numbers<[1], [0], [0], [1], [0, 0, 1, 1], [], []>} : vector<16x128xbf16>, vector<128x128xbf16>, vector<16x128xf32> -> vector<16x128xf32>
    %c0_15 = arith.constant 0 : index
    %c0_16 = arith.constant 0 : index
    %20 = vector.load %arg7[%c0_15, %c0_16] : memref<1x128xf32, #tpu.memory_space<vmem>>, vector<1x128xf32>
    %21 = vector.broadcast %20 : vector<1x128xf32> to vector<16x128xf32>
    %22 = arith.addf %19, %21 : vector<16x128xf32>
    %23 = vector.extract_strided_slice %22 {offsets = [0, 0], sizes = [16, 2], strides = [1, 1]} : vector<16x128xf32> to vector<16x2xf32>
    %c0_17 = arith.constant 0 : index
    %c0_18 = arith.constant 0 : index
    %24 = vector.load %arg8[%c0_17, %c0_18] : memref<16x2xf32, #tpu.memory_space<vmem>>, vector<16x2xf32>
    tpu.vector_store %arg8[%c0_17, %c0_18], %23 {strides = array<i32>} : memref<16x2xf32, #tpu.memory_space<vmem>>, vector<16x2xf32>,
    return
  }
  func.func @transform_0(%arg0: i32) -> (i32, i32) {
    %c0_i32 = arith.constant 0 : i32
    %c0_i32_0 = arith.constant 0 : i32
    return %arg0, %c0_i32 : i32, i32
  }
  func.func @transform_1(%arg0: i32) -> (i32, i32) {
    %c0_i32 = arith.constant 0 : i32
    %c0_i32_0 = arith.constant 0 : i32
    %c0_i32_1 = arith.constant 0 : i32
    return %c0_i32, %c0_i32_0 : i32, i32
  }
  func.func @transform_2(%arg0: i32) -> (i32, i32) {
    %c0_i32 = arith.constant 0 : i32
    %c0_i32_0 = arith.constant 0 : i32
    %c0_i32_1 = arith.constant 0 : i32
    return %c0_i32, %c0_i32_0 : i32, i32
  }
  func.func @transform_3(%arg0: i32) -> (i32, i32) {
    %c0_i32 = arith.constant 0 : i32
    %c0_i32_0 = arith.constant 0 : i32
    %c0_i32_1 = arith.constant 0 : i32
    return %c0_i32, %c0_i32_0 : i32, i32
  }
  func.func @transform_4(%arg0: i32) -> (i32, i32) {
    %c0_i32 = arith.constant 0 : i32
    %c0_i32_0 = arith.constant 0 : i32
    %c0_i32_1 = arith.constant 0 : i32
    return %c0_i32, %c0_i32_0 : i32, i32
  }
  func.func @transform_5(%arg0: i32) -> (i32, i32) {
    %c0_i32 = arith.constant 0 : i32
    %c0_i32_0 = arith.constant 0 : i32
    %c0_i32_1 = arith.constant 0 : i32
    return %c0_i32, %c0_i32_0 : i32, i32
  }
  func.func @transform_6(%arg0: i32) -> (i32, i32) {
    %c0_i32 = arith.constant 0 : i32
    %c0_i32_0 = arith.constant 0 : i32
    %c0_i32_1 = arith.constant 0 : i32
    return %c0_i32, %c0_i32_0 : i32, i32
  }
  func.func @transform_7(%arg0: i32) -> (i32, i32) {
    %c0_i32 = arith.constant 0 : i32
    %c0_i32_0 = arith.constant 0 : i32
    return %arg0, %c0_i32 : i32, i32
  }
}

module attributes {stable_mosaic.version = 11 : i64} {
  func.func @fcn_kernel(%arg0: i32, %arg1: memref<16x16xf32, #tpu.memory_space<vmem>>, %arg2: memref<16x128xbf16, #tpu.memory_space<vmem>>, %arg3: memref<1x128xf32, #tpu.memory_space<vmem>>, %arg4: memref<128x128xbf16, #tpu.memory_space<vmem>>, %arg5: memref<1x128xf32, #tpu.memory_space<vmem>>, %arg6: memref<128x128xbf16, #tpu.memory_space<vmem>>, %arg7: memref<1x128xf32, #tpu.memory_space<vmem>>, %arg8: memref<16x2xf32, #tpu.memory_space<vmem>>) attributes {dimension_semantics = [#tpu.dimension_semantics<parallel>], iteration_bounds = array<i64: 1>, scalar_prefetch = 0 : i64, scratch_operands = 0 : i64, tpu.core_type = #tpu.core_type<tc>, window_params = [{transform_indices = @transform_0, window_bounds = array<i64: 16, 16>}, {pipeline_mode = #tpu.pipeline_mode<synchronous>, transform_indices = @transform_1, window_bounds = array<i64: 16, 128>}, {pipeline_mode = #tpu.pipeline_mode<synchronous>, transform_indices = @transform_2, window_bounds = array<i64: 1, 128>}, {pipeline_mode = #tpu.pipeline_mode<synchronous>, transform_indices = @transform_3, window_bounds = array<i64: 128, 128>}, {pipeline_mode = #tpu.pipeline_mode<synchronous>, transform_indices = @transform_4, window_bounds = array<i64: 1, 128>}, {pipeline_mode = #tpu.pipeline_mode<synchronous>, transform_indices = @transform_5, window_bounds = array<i64: 128, 128>}, {pipeline_mode = #tpu.pipeline_mode<synchronous>, transform_indices = @transform_6, window_bounds = array<i64: 1, 128>}, {transform_indices = @transform_7, window_bounds = array<i64: 16, 2>}]} {
    %c0 = arith.constant 0 : index
    %c0_0 = arith.constant 0 : index
    %0 = vector.load %arg1[%c0, %c0_0] : memref<16x16xf32, #tpu.memory_space<vmem>>, vector<16x16xf32>
    %1 = arith.truncf %0 : vector<16x16xf32> to vector<16x16xbf16>
    %c0_1 = arith.constant 0 : index
    %c0_2 = arith.constant 0 : index
    %2 = vector.load %arg2[%c0_1, %c0_2] : memref<16x128xbf16, #tpu.memory_space<vmem>>, vector<16x128xbf16>
    %cst = arith.constant dense<0.000000e+00> : vector<16x128xf32>
    %3 = tpu.matmul %1, %2, %cst {dimension_numbers = #tpu.dot_dimension_numbers<[1], [0], [0], [1], [0, 0, 1, 1], [], []>} : vector<16x16xbf16>, vector<16x128xbf16>, vector<16x128xf32> -> vector<16x128xf32>
    %c0_3 = arith.constant 0 : index
    %c0_4 = arith.constant 0 : index
    %4 = vector.load %arg3[%c0_3, %c0_4] : memref<1x128xf32, #tpu.memory_space<vmem>>, vector<1x128xf32>
    %5 = vector.broadcast %4 : vector<1x128xf32> to vector<16x128xf32>
    %6 = arith.addf %3, %5 : vector<16x128xf32>
    %cst_5 = arith.constant 0.000000e+00 : f32
    %7 = vector.broadcast %cst_5 : f32 to vector<16x128xf32>
    %8 = arith.maximumf %6, %7 : vector<16x128xf32>
    %9 = arith.truncf %8 : vector<16x128xf32> to vector<16x128xbf16>
    %c0_6 = arith.constant 0 : index
    %c0_7 = arith.constant 0 : index
    %10 = vector.load %arg4[%c0_6, %c0_7] : memref<128x128xbf16, #tpu.memory_space<vmem>>, vector<128x128xbf16>
    %cst_8 = arith.constant dense<0.000000e+00> : vector<16x128xf32>
    %11 = tpu.matmul %9, %10, %cst_8 {dimension_numbers = #tpu.dot_dimension_numbers<[1], [0], [0], [1], [0, 0, 1, 1], [], []>} : vector<16x128xbf16>, vector<128x128xbf16>, vector<16x128xf32> -> vector<16x128xf32>
    %c0_9 = arith.constant 0 : index
    %c0_10 = arith.constant 0 : index
    %12 = vector.load %arg5[%c0_9, %c0_10] : memref<1x128xf32, #tpu.memory_space<vmem>>, vector<1x128xf32>
    %13 = vector.broadcast %12 : vector<1x128xf32> to vector<16x128xf32>
    %14 = arith.addf %11, %13 : vector<16x128xf32>
    %cst_11 = arith.constant 0.000000e+00 : f32
    %15 = vector.broadcast %cst_11 : f32 to vector<16x128xf32>
    %16 = arith.maximumf %14, %15 : vector<16x128xf32>
    %17 = arith.truncf %16 : vector<16x128xf32> to vector<16x128xbf16>
    %c0_12 = arith.constant 0 : index
    %c0_13 = arith.constant 0 : index
    %18 = vector.load %arg6[%c0_12, %c0_13] : memref<128x128xbf16, #tpu.memory_space<vmem>>, vector<128x128xbf16>
    %cst_14 = arith.constant dense<0.000000e+00> : vector<16x128xf32>
    %19 = tpu.matmul %17, %18, %cst_14 {dimension_numbers = #tpu.dot_dimension_numbers<[1], [0], [0], [1], [0, 0, 1, 1], [], []>} : vector<16x128xbf16>, vector<128x128xbf16>, vector<16x128xf32> -> vector<16x128xf32>
    %c0_15 = arith.constant 0 : index
    %c0_16 = arith.constant 0 : index
    %20 = vector.load %arg7[%c0_15, %c0_16] : memref<1x128xf32, #tpu.memory_space<vmem>>, vector<1x128xf32>
    %21 = vector.broadcast %20 : vector<1x128xf32> to vector<16x128xf32>
    %22 = arith.addf %19, %21 : vector<16x128xf32>
    %23 = vector.extract_strided_slice %22 {offsets = [0, 0], sizes = [16, 2], strides = [1, 1]} : vector<16x128xf32> to vector<16x2xf32>
    %c0_17 = arith.constant 0 : index
    %c0_18 = arith.constant 0 : index
    %24 = vector.load %arg8[%c0_17, %c0_18] : memref<16x2xf32, #tpu.memory_space<vmem>>, vector<16x2xf32>
    tpu.vector_store %arg8[%c0_17, %c0_18], %23 {strides = array<i32>} : memref<16x2xf32, #tpu.memory_space<vmem>>, vector<16x2xf32>,
    return
  }
  func.func @transform_0(%arg0: i32) -> (i32, i32) {
    %c0_i32 = arith.constant 0 : i32
    %c0_i32_0 = arith.constant 0 : i32
    return %arg0, %c0_i32 : i32, i32
  }
  func.func @transform_1(%arg0: i32) -> (i32, i32) {
    %c0_i32 = arith.constant 0 : i32
    %c0_i32_0 = arith.constant 0 : i32
    %c0_i32_1 = arith.constant 0 : i32
    return %c0_i32, %c0_i32_0 : i32, i32
  }
  func.func @transform_2(%arg0: i32) -> (i32, i32) {
    %c0_i32 = arith.constant 0 : i32
    %c0_i32_0 = arith.constant 0 : i32
    %c0_i32_1 = arith.constant 0 : i32
    return %c0_i32, %c0_i32_0 : i32, i32
  }
  func.func @transform_3(%arg0: i32) -> (i32, i32) {
    %c0_i32 = arith.constant 0 : i32
    %c0_i32_0 = arith.constant 0 : i32
    %c0_i32_1 = arith.constant 0 : i32
    return %c0_i32, %c0_i32_0 : i32, i32
  }
  func.func @transform_4(%arg0: i32) -> (i32, i32) {
    %c0_i32 = arith.constant 0 : i32
    %c0_i32_0 = arith.constant 0 : i32
    %c0_i32_1 = arith.constant 0 : i32
    return %c0_i32, %c0_i32_0 : i32, i32
  }
  func.func @transform_5(%arg0: i32) -> (i32, i32) {
    %c0_i32 = arith.constant 0 : i32
    %c0_i32_0 = arith.constant 0 : i32
    %c0_i32_1 = arith.constant 0 : i32
    return %c0_i32, %c0_i32_0 : i32, i32
  }
  func.func @transform_6(%arg0: i32) -> (i32, i32) {
    %c0_i32 = arith.constant 0 : i32
    %c0_i32_0 = arith.constant 0 : i32
    %c0_i32_1 = arith.constant 0 : i32
    return %c0_i32, %c0_i32_0 : i32, i32
  }
  func.func @transform_7(%arg0: i32) -> (i32, i32) {
    %c0_i32 = arith.constant 0 : i32
    %c0_i32_0 = arith.constant 0 : i32
    return %arg0, %c0_i32 : i32, i32
  }
}

</mosaic_0001>

<bundles_post_ra>
// kernel: tpu_custom_call.1
= control target key start
LH: loop header
LB: loop body
LE: loop exit
PB: predicated region body
PF: predicated region fallthrough
CT: control target
= control target key end

     0   :  { %12 = vsyncpa [#allocation3], 0  ;;  %s577_s0 = inlined_call_operand.hbm [shape: f32[16,16], index: 0, kind: input, shape index: {}]   ;;  %s578_s1 = inlined_call_operand.hbm [shape: bf16[16,128], index: 1, kind: input, shape index: {}]   ;;  %s579_s2 = inlined_call_operand.vmem [shape: f32[1,128], index: 2, kind: input, shape index: {}]   ;;  %s580_s3 = inlined_call_operand.hbm [shape: bf16[128,128], index: 3, kind: input, shape index: {}]   ;;  %s581_s4 = inlined_call_operand.vmem [shape: f32[1,128], index: 4, kind: input, shape index: {}]   ;;  %s582_s5 = inlined_call_operand.hbm [shape: bf16[128,128], index: 5, kind: input, shape index: {}]   ;;  %s583_s6 = inlined_call_operand.vmem [shape: f32[1,128], index: 6, kind: input, shape index: {}]   ;;  %s584_s7 = inlined_call_operand.vmem [shape: f32[16,2], index: 7, kind: output, shape index: {}]  }
   0x1   :  { %13 = vsyncpa [#allocation5], 0  ;;  %s32_s26 = sshll.u32 %s578_s1, 4  ;;  %s33_s26 = int_to_ptr.hbm [resolvable:$true] %s32_s26 }
   0x2   :  { %14 = vsyncpa [#allocation8], 0  ;;  %s502_s27 = smov [#allocation4]   ;;  %s19_s8 = sshll.u32 %s577_s0, 4  ;;  %s20_s8 = int_to_ptr.hbm [resolvable:$true] %s19_s8 }
   0x3   :  { %s34_s28 = sshll.u32 %s502_s27, 4  ;;  %s503_s9 = smov 64   ;;  %s35_s28 = int_to_ptr.vmem [resolvable:$true] %s34_s28 }
   0x4   :  { %s504_s10 = smov 4   ;;  %s505_s11 = smov [#allocation2]  }
   0x5   :  { %40 = dma.hbm_to_vmem [thread:$0]  %s33_s26, 128, %s35_s28, [#allocation5], %s503_s9, %s503_s9, %s504_s10  }
   0x6   :  { %s21_s12 = sshll.u32 %s505_s11, 4  ;;  %s506_s13 = smov 128   ;;  %s22_s12 = int_to_ptr.vmem [resolvable:$true] %s21_s12 }
   0x7   :  { %s507_s14 = smov 8   ;;  %s47_s16 = sshll.u32 %s580_s3, 4  ;;  %s48_s16 = int_to_ptr.hbm [resolvable:$true] %s47_s16 }
   0x8   :  { %27 = dma.hbm_to_vmem [thread:$0]  %s20_s8, 256, %s22_s12, [#allocation3], %s506_s13, %s506_s13, %s507_s14  }
   0x9   :  { %s508_s17 = smov [#allocation6]   ;;  %s62_s20 = sshll.u32 %s582_s5, 4  ;;  %s63_s20 = int_to_ptr.hbm [resolvable:$true] %s62_s20 }
   0xa   :  { %s49_s18 = sshll.u32 %s508_s17, 4  ;;  %s509_s21 = smov [#allocation7]   ;;  %s50_s18 = int_to_ptr.vmem [resolvable:$true] %s49_s18 }
   0xb   :  { %55 = dma.hbm_to_vmem [thread:$0]  %s48_s16, 1024, %s50_s18, [#allocation5], %s503_s9, %s503_s9, %s504_s10  }
   0xc   :  { %s64_s22 = sshll.u32 %s509_s21, 4  ;;  %s65_s22 = int_to_ptr.vmem [resolvable:$true] %s64_s22 }
   0xd   :  { %70 = dma.hbm_to_vmem [thread:$0]  %s63_s20, 1024, %s65_s22, [#allocation8], %s503_s9, %s503_s9, %s504_s10  }
   0xe   :  { %496 = dma.done.wait [#allocation3], 256  }
   0xf   :  { %497 = vsyncadd [#allocation3], 4294967040 }
  0x10   :  { %498 = dma.done.wait [#allocation5], 1152  }
  0x11   :  { %499 = vsyncadd [#allocation5], 4294966144 }
  0x12   :  { %500 = dma.done.wait [#allocation8], 1024  }
  0x13   :  { %501 = vsyncadd [#allocation8], 4294966272  ;;  %v372_v0 = vld [vmem:[#allocation4] sm:$0xff]  ;;  %v90_v1 = vld [vmem:[#allocation2] sm:$0xff]  ;;  %vm105_vm0 = vcmask 130048   ;;  %vm293_vm1 = vcmask 15360  }
  0x14   :  { %v91_v2 = vld [vmem:[#allocation2 + $0x8] sm:$0xff]  ;;  %v380_v4 = vld [vmem:[#allocation6 + $0x38] sm:$0xff]  ;;  %116 = vmatpush.bf16.msra.mxu0 %v372_v0  ;;  %v378_v6 = vld [vmem:[#allocation6 + $0x28] sm:$0xff] }
  0x15   :  { %v92_v3 = vpack.c.bf16 %v91_v2, %v90_v1  ;;  %194 = vmatpush.bf16.msra.mxu1 %v380_v4  ;;  %v379_v5 = vld [vmem:[#allocation6 + $0x30] sm:$0xff]  ;;  %v377_v7 = vld [vmem:[#allocation6 + $0x20] sm:$0xff]  ;;  %v376_v8 = vld [vmem:[#allocation6 + $0x18] sm:$0xff] }
  0x16   :  { %v375_v9 = vld [vmem:[#allocation6 + $0x10] sm:$0xff]  ;;  %v374_v10 = vld [vmem:[#allocation6 + $0x8] sm:$0xff]  ;;  %v373_v11 = vld [vmem:[#allocation6] sm:$0xff] }
  0x17   :  { %307 = vmatmul.msk.bf16.vlgmr.msra.gmra.mxu0 %vm105_vm0, %v92_v3  ;;  %v388_v12 = vld [vmem:[#allocation7 + $0x38] sm:$0xff]  ;;  %v387_v13 = vld [vmem:[#allocation7 + $0x30] sm:$0xff]  ;;  %v386_v14 = vld [vmem:[#allocation7 + $0x28] sm:$0xff] }
  0x18   :  { %279 = vmatpush.bf16.msra.mxu2 %v388_v12  ;;  %v385_v15 = vld [vmem:[#allocation7 + $0x20] sm:$0xff]  ;;  %v397_v17 = vld [vmem:[%s579_s2] ss:$0 sm:$0xff]  ;;  %v384_v24 = vld [vmem:[#allocation7 + $0x18] sm:$0xff] }
  0x19   :  { %195 = vmatpush.bf16.msra.mxu1 %v379_v5  ;;  %v383_v25 = vld [vmem:[#allocation7 + $0x10] sm:$0xff]  ;;  %v382_v26 = vld [vmem:[#allocation7 + $0x8] sm:$0xff]  ;;  %v381_v27 = vld [vmem:[#allocation7] sm:$0xff] }
  0x1a   :  { %v398_v29 = vld [vmem:[%s581_s4] ss:$0 sm:$0xff] }
  0x1b   :  { %v399_v36 = vld [vmem:[%s583_s6] ss:$0 sm:$0xff] }
  0x1c   :  { %280 = vmatpush.bf16.msra.mxu2 %v387_v13 }
  0x1d   :  { %196 = vmatpush.bf16.msra.mxu1 %v378_v6 }
  0x20   :  { %281 = vmatpush.bf16.msra.mxu2 %v386_v14 }
  0x21   :  { %197 = vmatpush.bf16.msra.mxu1 %v377_v7 }
  0x24   :  { %282 = vmatpush.bf16.msra.mxu2 %v385_v15 }
  0x25   :  { %198 = vmatpush.bf16.msra.mxu1 %v376_v8 }
  0x28   :  { %283 = vmatpush.bf16.msra.mxu2 %v384_v24 }
  0x29   :  { %199 = vmatpush.bf16.msra.mxu1 %v375_v9 }
  0x2c   :  { %284 = vmatpush.bf16.msra.mxu2 %v383_v25 }
  0x2d   :  { %200 = vmatpush.bf16.msra.mxu1 %v374_v10 }
  0x30   :  { %285 = vmatpush.bf16.msra.mxu2 %v382_v26 }
  0x31   :  { %201 = vmatpush.bf16.msra.mxu1 %v373_v11 }
  0x34   :  { %286 = vmatpush.bf16.msra.mxu2 %v381_v27 }
  0x94   :  { %v118_v16 = vpop.f32.mrf.mxu0 }
  0x95   :  { %v119_v18 = vadd.f32 %v397_v17, %v118_v16 }
  0x97   :  { %v123_v21 = vmax.f32 %v119_v18, 0.0 }
  0x9c   :  { %v120_v19 = vpop.f32.mrf.mxu0 }
  0x9d   :  { %v121_v20 = vadd.f32 %v397_v17, %v120_v19 }
  0x9f   :  { %v124_v22 = vmax.f32 %v121_v20, 0.0 }
  0xa1   :  { %v125_v23 = vpack.c.bf16 %v124_v22, %v123_v21 }
  0xa3   :  { %202 = vmatmul.bf16.vlgmr.msra.gmra.mxu1 %v125_v23 }
 0x120   :  { %v203_v28 = vpop.f32.mrf.mxu1 }
 0x121   :  { %v204_v30 = vadd.f32 %v398_v29, %v203_v28 }
 0x123   :  { %v208_v33 = vmax.f32 %v204_v30, 0.0 }
 0x128   :  { %v205_v31 = vpop.f32.mrf.mxu1 }
 0x129   :  { %v206_v32 = vadd.f32 %v398_v29, %v205_v31 }
 0x12b   :  { %v209_v34 = vmax.f32 %v206_v32, 0.0 }
 0x12d   :  { %v210_v35 = vpack.c.bf16 %v209_v34, %v208_v33 }
 0x12f   :  { %287 = vmatmul.bf16.vlgmr.msra.gmra.mxu2 %v210_v35 }
 0x1b2   :  { %v288_v37 = vpop.f32.mrf.mxu2 }
 0x1b3   :  { %v289_v38 = vadd.f32 %v399_v36, %v288_v37 }
 0x1b5   :  { %294 = vst.msk [vmem:[%s584_s7] sm:$0xff] %vm293_vm1, %v289_v38 }
 0x1ba   :  { %v290_v39 = vpop.f32.mrf.mxu2 }
 0x1bb   :  { %v291_v40 = vadd.f32 %v399_v36, %v290_v39 }
 0x1bd   :  { %295 = vst.msk [vmem:[%s584_s7 + $0x8] sm:$0xff] %vm293_vm1, %v291_v40 }
 0x1be   :  { %300 = vsyncpa [#allocation3], 1 }
 0x1bf   :  { %301 = vsyncpa [#allocation5], 1 }
 0x1c0   :  { %302 = vsyncpa [#allocation8], 1 }

// kernel: tpu_custom_call.1
= control target key start
LH: loop header
LB: loop body
LE: loop exit
PB: predicated region body
PF: predicated region fallthrough
CT: control target
= control target key end

     0   :  { %12 = vsyncpa [#allocation3], 0  ;;  %s577_s0 = inlined_call_operand.hbm [shape: f32[16,16], index: 0, kind: input, shape index: {}]   ;;  %s578_s1 = inlined_call_operand.hbm [shape: bf16[16,128], index: 1, kind: input, shape index: {}]   ;;  %s579_s2 = inlined_call_operand.vmem [shape: f32[1,128], index: 2, kind: input, shape index: {}]   ;;  %s580_s3 = inlined_call_operand.hbm [shape: bf16[128,128], index: 3, kind: input, shape index: {}]   ;;  %s581_s4 = inlined_call_operand.vmem [shape: f32[1,128], index: 4, kind: input, shape index: {}]   ;;  %s582_s5 = inlined_call_operand.hbm [shape: bf16[128,128], index: 5, kind: input, shape index: {}]   ;;  %s583_s6 = inlined_call_operand.vmem [shape: f32[1,128], index: 6, kind: input, shape index: {}]   ;;  %s584_s7 = inlined_call_operand.vmem [shape: f32[16,2], index: 7, kind: output, shape index: {}]  }
   0x1   :  { %13 = vsyncpa [#allocation5], 0  ;;  %s32_s26 = sshll.u32 %s578_s1, 4  ;;  %s33_s26 = int_to_ptr.hbm [resolvable:$true] %s32_s26 }
   0x2   :  { %14 = vsyncpa [#allocation8], 0  ;;  %s502_s27 = smov [#allocation4]   ;;  %s19_s8 = sshll.u32 %s577_s0, 4  ;;  %s20_s8 = int_to_ptr.hbm [resolvable:$true] %s19_s8 }
   0x3   :  { %s34_s28 = sshll.u32 %s502_s27, 4  ;;  %s503_s9 = smov 64   ;;  %s35_s28 = int_to_ptr.vmem [resolvable:$true] %s34_s28 }
   0x4   :  { %s504_s10 = smov 4   ;;  %s505_s11 = smov [#allocation2]  }
   0x5   :  { %40 = dma.hbm_to_vmem [thread:$0]  %s33_s26, 128, %s35_s28, [#allocation5], %s503_s9, %s503_s9, %s504_s10  }
   0x6   :  { %s21_s12 = sshll.u32 %s505_s11, 4  ;;  %s506_s13 = smov 128   ;;  %s22_s12 = int_to_ptr.vmem [resolvable:$true] %s21_s12 }
   0x7   :  { %s507_s14 = smov 8   ;;  %s47_s16 = sshll.u32 %s580_s3, 4  ;;  %s48_s16 = int_to_ptr.hbm [resolvable:$true] %s47_s16 }
   0x8   :  { %27 = dma.hbm_to_vmem [thread:$0]  %s20_s8, 256, %s22_s12, [#allocation3], %s506_s13, %s506_s13, %s507_s14  }
   0x9   :  { %s508_s17 = smov [#allocation6]   ;;  %s62_s20 = sshll.u32 %s582_s5, 4  ;;  %s63_s20 = int_to_ptr.hbm [resolvable:$true] %s62_s20 }
   0xa   :  { %s49_s18 = sshll.u32 %s508_s17, 4  ;;  %s509_s21 = smov [#allocation7]   ;;  %s50_s18 = int_to_ptr.vmem [resolvable:$true] %s49_s18 }
   0xb   :  { %55 = dma.hbm_to_vmem [thread:$0]  %s48_s16, 1024, %s50_s18, [#allocation5], %s503_s9, %s503_s9, %s504_s10  }
   0xc   :  { %s64_s22 = sshll.u32 %s509_s21, 4  ;;  %s65_s22 = int_to_ptr.vmem [resolvable:$true] %s64_s22 }
   0xd   :  { %70 = dma.hbm_to_vmem [thread:$0]  %s63_s20, 1024, %s65_s22, [#allocation8], %s503_s9, %s503_s9, %s504_s10  }
   0xe   :  { %496 = dma.done.wait [#allocation3], 256  }
   0xf   :  { %497 = vsyncadd [#allocation3], 4294967040 }
  0x10   :  { %498 = dma.done.wait [#allocation5], 1152  }
  0x11   :  { %499 = vsyncadd [#allocation5], 4294966144 }
  0x12   :  { %500 = dma.done.wait [#allocation8], 1024  }
  0x13   :  { %501 = vsyncadd [#allocation8], 4294966272  ;;  %v372_v0 = vld [vmem:[#allocation4] sm:$0xff]  ;;  %v90_v1 = vld [vmem:[#allocation2] sm:$0xff]  ;;  %vm105_vm0 = vcmask 130048   ;;  %vm293_vm1 = vcmask 15360  }
  0x14   :  { %v91_v2 = vld [vmem:[#allocation2 + $0x8] sm:$0xff]  ;;  %v380_v4 = vld [vmem:[#allocation6 + $0x38] sm:$0xff]  ;;  %116 = vmatpush.bf16.msra.mxu0 %v372_v0  ;;  %v378_v6 = vld [vmem:[#allocation6 + $0x28] sm:$0xff] }
  0x15   :  { %v92_v3 = vpack.c.bf16 %v91_v2, %v90_v1  ;;  %194 = vmatpush.bf16.msra.mxu1 %v380_v4  ;;  %v379_v5 = vld [vmem:[#allocation6 + $0x30] sm:$0xff]  ;;  %v377_v7 = vld [vmem:[#allocation6 + $0x20] sm:$0xff]  ;;  %v376_v8 = vld [vmem:[#allocation6 + $0x18] sm:$0xff] }
  0x16   :  { %v375_v9 = vld [vmem:[#allocation6 + $0x10] sm:$0xff]  ;;  %v374_v10 = vld [vmem:[#allocation6 + $0x8] sm:$0xff]  ;;  %v373_v11 = vld [vmem:[#allocation6] sm:$0xff] }
  0x17   :  { %307 = vmatmul.msk.bf16.vlgmr.msra.gmra.mxu0 %vm105_vm0, %v92_v3  ;;  %v388_v12 = vld [vmem:[#allocation7 + $0x38] sm:$0xff]  ;;  %v387_v13 = vld [vmem:[#allocation7 + $0x30] sm:$0xff]  ;;  %v386_v14 = vld [vmem:[#allocation7 + $0x28] sm:$0xff] }
  0x18   :  { %279 = vmatpush.bf16.msra.mxu2 %v388_v12  ;;  %v385_v15 = vld [vmem:[#allocation7 + $0x20] sm:$0xff]  ;;  %v397_v17 = vld [vmem:[%s579_s2] ss:$0 sm:$0xff]  ;;  %v384_v24 = vld [vmem:[#allocation7 + $0x18] sm:$0xff] }
  0x19   :  { %195 = vmatpush.bf16.msra.mxu1 %v379_v5  ;;  %v383_v25 = vld [vmem:[#allocation7 + $0x10] sm:$0xff]  ;;  %v382_v26 = vld [vmem:[#allocation7 + $0x8] sm:$0xff]  ;;  %v381_v27 = vld [vmem:[#allocation7] sm:$0xff] }
  0x1a   :  { %v398_v29 = vld [vmem:[%s581_s4] ss:$0 sm:$0xff] }
  0x1b   :  { %v399_v36 = vld [vmem:[%s583_s6] ss:$0 sm:$0xff] }
  0x1c   :  { %280 = vmatpush.bf16.msra.mxu2 %v387_v13 }
  0x1d   :  { %196 = vmatpush.bf16.msra.mxu1 %v378_v6 }
  0x20   :  { %281 = vmatpush.bf16.msra.mxu2 %v386_v14 }
  0x21   :  { %197 = vmatpush.bf16.msra.mxu1 %v377_v7 }
  0x24   :  { %282 = vmatpush.bf16.msra.mxu2 %v385_v15 }
  0x25   :  { %198 = vmatpush.bf16.msra.mxu1 %v376_v8 }
  0x28   :  { %283 = vmatpush.bf16.msra.mxu2 %v384_v24 }
  0x29   :  { %199 = vmatpush.bf16.msra.mxu1 %v375_v9 }
  0x2c   :  { %284 = vmatpush.bf16.msra.mxu2 %v383_v25 }
  0x2d   :  { %200 = vmatpush.bf16.msra.mxu1 %v374_v10 }
  0x30   :  { %285 = vmatpush.bf16.msra.mxu2 %v382_v26 }
  0x31   :  { %201 = vmatpush.bf16.msra.mxu1 %v373_v11 }
  0x34   :  { %286 = vmatpush.bf16.msra.mxu2 %v381_v27 }
  0x94   :  { %v118_v16 = vpop.f32.mrf.mxu0 }
  0x95   :  { %v119_v18 = vadd.f32 %v397_v17, %v118_v16 }
  0x97   :  { %v123_v21 = vmax.f32 %v119_v18, 0.0 }
  0x9c   :  { %v120_v19 = vpop.f32.mrf.mxu0 }
  0x9d   :  { %v121_v20 = vadd.f32 %v397_v17, %v120_v19 }
  0x9f   :  { %v124_v22 = vmax.f32 %v121_v20, 0.0 }
  0xa1   :  { %v125_v23 = vpack.c.bf16 %v124_v22, %v123_v21 }
  0xa3   :  { %202 = vmatmul.bf16.vlgmr.msra.gmra.mxu1 %v125_v23 }
 0x120   :  { %v203_v28 = vpop.f32.mrf.mxu1 }
 0x121   :  { %v204_v30 = vadd.f32 %v398_v29, %v203_v28 }
 0x123   :  { %v208_v33 = vmax.f32 %v204_v30, 0.0 }
 0x128   :  { %v205_v31 = vpop.f32.mrf.mxu1 }
 0x129   :  { %v206_v32 = vadd.f32 %v398_v29, %v205_v31 }
 0x12b   :  { %v209_v34 = vmax.f32 %v206_v32, 0.0 }
 0x12d   :  { %v210_v35 = vpack.c.bf16 %v209_v34, %v208_v33 }
 0x12f   :  { %287 = vmatmul.bf16.vlgmr.msra.gmra.mxu2 %v210_v35 }
 0x1b2   :  { %v288_v37 = vpop.f32.mrf.mxu2 }
 0x1b3   :  { %v289_v38 = vadd.f32 %v399_v36, %v288_v37 }
 0x1b5   :  { %294 = vst.msk [vmem:[%s584_s7] sm:$0xff] %vm293_vm1, %v289_v38 }
 0x1ba   :  { %v290_v39 = vpop.f32.mrf.mxu2 }
 0x1bb   :  { %v291_v40 = vadd.f32 %v399_v36, %v290_v39 }
 0x1bd   :  { %295 = vst.msk [vmem:[%s584_s7 + $0x8] sm:$0xff] %vm293_vm1, %v291_v40 }
 0x1be   :  { %300 = vsyncpa [#allocation3], 1 }
 0x1bf   :  { %301 = vsyncpa [#allocation5], 1 }
 0x1c0   :  { %302 = vsyncpa [#allocation8], 1 }

</bundles_post_ra>
